<compile_context>
chip_gen: v7x
topology: tpu7x:2x2x1
jax: 0.10.0
libtpu: 0.0.40
codegen_flags: <defaults>
</compile_context>

<pallas_src>
import functools

import jax
import jax.numpy as jnp
from jax import lax
from jax.experimental import pallas as pl
from jax.experimental.pallas import tpu as pltpu

_LANES = 128
_SUBLANES = 8
_CHUNK_ROWS = 128            # per-sub-chunk temporaries: (128,128) f32 = 64 KiB
_MAX_BLOCK_ROWS = 1024       # 1024 x 128 f32 = 512 KiB per input block buffer
_NEUTRAL = 1e30              # softplus(-1e30) == 0.0 exactly in f32
_FALLBACK_ELEMS = 4096       # below this, launch overhead dominates -> plain XLA
_KERNEL_DTYPES = (jnp.float32, jnp.bfloat16, jnp.float16)


def _cdiv(a, b):
    return -(-a // b)


def _round_down(a, b):
    return (a // b) * b


def _stable_softplus(x, use_bf16_transcendentals):
    # softplus(x) = max(x, 0) + log1p(exp(-|x|));  x is already f32 here.
    if use_bf16_transcendentals:
        t = jnp.log1p(jnp.exp(-jnp.abs(x).astype(jnp.bfloat16))).astype(jnp.float32)
    else:
        t = jnp.log1p(jnp.exp(-jnp.abs(x)))
    return jnp.maximum(x, 0.0) + t


def _vanila_loss_kernel(real_ref, gene_ref, out_ref, *, nb_half, block_rows,
                        rows_valid, needs_mask, use_bf16_transcendentals):
    c = pl.program_id(0)      # core-split ("parallel") axis
    r = pl.program_id(1)      # reduction ("arbitrary") axis

    @pl.when(r == 0)
    def _():
        out_ref[...] = jnp.zeros(out_ref.shape, out_ref.dtype)

    # Global row offset of this block, from the UN-clamped block index, so rows
    # belonging to clamped (duplicate) blocks or block over-reads are masked out.
    row0 = (c * nb_half + r) * block_rows

    part = jnp.zeros((_SUBLANES, _LANES), jnp.float32)
    for off in range(0, block_rows, _CHUNK_ROWS):           # static sub-chunk loop
        rc = min(_CHUNK_ROWS, block_rows - off)              # multiple of 8
        xr = -(real_ref[off:off + rc, :].astype(jnp.float32))   # softplus(-logit_real)
        xg = gene_ref[off:off + rc, :].astype(jnp.float32)      # softplus(+logit_gene)
        sp = (_stable_softplus(xr, use_bf16_transcendentals)
              + _stable_softplus(xg, use_bf16_transcendentals))
        if needs_mask:
            rid = lax.broadcasted_iota(jnp.int32, (rc, _LANES), 0) + (row0 + off)
            sp = jnp.where(rid < rows_valid, sp, 0.0)
        # VALU-only partial reduce into one vreg: (rc,128)->(rc/8,8,128), sum leading.
        part = part + sp.reshape(rc // _SUBLANES, _SUBLANES, _LANES).sum(axis=0)

    out_ref[0] += part        # the (1,8,128) output block doubles as the accumulator


def _softplus_mean_ref(logit_real, logit_gene):
    return 0.5 * (jnp.mean(jax.nn.softplus(-logit_real.astype(jnp.float32)))
                  + jnp.mean(jax.nn.softplus(logit_gene.astype(jnp.float32))))


def _canon(x):
    return x if any(x.dtype == d for d in _KERNEL_DTYPES) else x.astype(jnp.float32)


def _row_align(x):
    # (8,128) minimum tile for 4-byte dtypes, (16,128) for 2-byte dtypes.
    return _SUBLANES * (4 // x.dtype.itemsize)


def _to_slab(x, pad_value):
    """Flatten to a lane-dense (rows, 128) slab.  Copy-free when size % 128 == 0."""
    n = x.size
    rows = _cdiv(n, _LANES)
    flat = x.reshape(-1)
    if rows * _LANES != n:
        # TODO(synk): this <128-element logical pad still costs one XLA copy of the
        # array; a fully copy-free ragged path needs 1-D blocks + element masks.
        flat = jnp.pad(flat, (0, rows * _LANES - n), constant_values=pad_value)
    return flat.reshape(rows, _LANES), rows


def vanila_loss(logit_real, logit_gene, *, use_bf16_transcendentals=False):
    """0.5 * (mean(softplus(-logit_real)) + mean(softplus(logit_gene)))."""
    n = logit_real.size
    if logit_gene.size != n or n < _FALLBACK_ELEMS:
        # Tiny inputs: launch + pipeline fill/drain dominates -> plain XLA.
        # TODO(synk): unequal real/gene element counts (atypical for a GAN loss)
        # also take the plain-XLA path instead of a second kernel variant.
        return _softplus_mean_ref(logit_real, logit_gene)

    logit_real = _canon(logit_real)
    logit_gene = _canon(logit_gene)

    # Neutral pads: softplus(-(+1e30)) == 0 and softplus(-1e30) == 0 exactly in f32.
    real_slab, rows = _to_slab(logit_real, +_NEUTRAL)
    gene_slab, _ = _to_slab(logit_gene, -_NEUTRAL)

    align = max(_row_align(real_slab), _row_align(gene_slab))
    block_rows = min(_MAX_BLOCK_ROWS, _round_down(rows, align))  # rows >= 32 >= align
    nb = _cdiv(rows, block_rows)             # row blocks (last one may be partial)
    nsplit = 2 if nb >= 2 else 1             # v7x: one block range per TensorCore
    nb_half = _cdiv(nb, nsplit)
    needs_mask = (nsplit * nb_half * block_rows != rows)
    needs_clamp = (nsplit * nb_half != nb)

    if needs_clamp:
        in_map = lambda c, r: (jnp.minimum(c * nb_half + r, nb - 1), 0)
    else:
        in_map = lambda c, r: (c * nb_half + r, 0)

    kernel = functools.partial(
        _vanila_loss_kernel,
        nb_half=nb_half, block_rows=block_rows, rows_valid=rows,
        needs_mask=needs_mask, use_bf16_transcendentals=use_bf16_transcendentals)

    bytes_in = (real_slab.size * real_slab.dtype.itemsize
                + gene_slab.size * gene_slab.dtype.itemsize)
    cost = pl.CostEstimate(
        flops=8 * 2 * n,
        transcendentals=2 * 2 * n,
        bytes_accessed=bytes_in + nsplit * _SUBLANES * _LANES * 4)

    partials = pl.pallas_call(
        kernel,
        out_shape=jax.ShapeDtypeStruct((nsplit, _SUBLANES, _LANES), jnp.float32),
        grid_spec=pltpu.PrefetchScalarGridSpec(
            num_scalar_prefetch=0,
            grid=(nsplit, nb_half),
            in_specs=[pl.BlockSpec((block_rows, _LANES), in_map),
                      pl.BlockSpec((block_rows, _LANES), in_map)],
            out_specs=pl.BlockSpec((1, _SUBLANES, _LANES), lambda c, r: (c, 0, 0)),
        ),
        compiler_params=pltpu.CompilerParams(
            dimension_semantics=("parallel", "arbitrary")),
        cost_estimate=cost,
    )(real_slab, gene_slab)

    return (0.5 / n) * jnp.sum(partials)


if __name__ == "__main__":
    key = jax.random.PRNGKey(0)
    jitted = jax.jit(vanila_loss)

    # Primary example: PatchGAN-style discriminator logit maps (kernel path).
    kr, kg = jax.random.split(key)
    logit_real = 3.0 * jax.random.normal(kr, (2, 1, 64, 64), dtype=jnp.float32)
    logit_gene = 3.0 * jax.random.normal(kg, (2, 1, 64, 64), dtype=jnp.float32)
    loss = jitted(logit_real, logit_gene)
    jax.block_until_ready(loss)
    ref = _softplus_mean_ref(logit_real, logit_gene)
    assert jnp.allclose(loss, ref, atol=1e-5, rtol=1e-5), (loss, ref)

    # Extra coverage: fallback, exact 2-block core split, 3-block split with
    # clamped duplicate block + row mask, partial last block, ragged sizes.
    shapes = [
        (2, 1, 16, 16),     # tiny -> XLA fallback
        (4, 8, 64, 128),    # rows=2048: two full 1024-row blocks, one per core slot
        (4, 8, 96, 128),    # rows=3072: 3 blocks -> clamped index + row mask
        (2, 3, 33, 128),    # rows=198: partial last block -> row mask
        (2, 1, 50, 50),     # n=5000: ragged -> neutral lane pad, exact rows
        (3, 1, 37, 41),     # n=4551: ragged + partial last block
    ]
    for idx, shape in enumerate(shapes):
        kr, kg = jax.random.split(jax.random.fold_in(key, idx + 1))
        lr = 3.0 * jax.random.normal(kr, shape, dtype=jnp.float32)
        lg = 3.0 * jax.random.normal(kg, shape, dtype=jnp.float32)
        got = jax.jit(vanila_loss)(lr, lg)
        jax.block_until_ready(got)
        want = _softplus_mean_ref(lr, lg)
        assert jnp.allclose(got, want, atol=1e-5, rtol=1e-5), (shape, got, want)

    # Unequal element counts -> plain-XLA path (just exercise it).
    got = jax.jit(vanila_loss)(logit_real, jnp.concatenate([logit_gene, logit_gene]))
    jax.block_until_ready(got)

    print("KERNEL_OK")
</pallas_src>

<mosaic_0001>
module attributes {stable_mosaic.version = 11 : i64} {
  func.func @_vanila_loss_kernel(%arg0: i32, %arg1: i32, %arg2: memref<64x128xf32, #tpu.memory_space<vmem>>, %arg3: memref<64x128xf32, #tpu.memory_space<vmem>>, %arg4: memref<1x8x128xf32, #tpu.memory_space<vmem>>) attributes {dimension_semantics = [#tpu.dimension_semantics<parallel>, #tpu.dimension_semantics<arbitrary>], iteration_bounds = array<i64: 1, 1>, scalar_prefetch = 0 : i64, scratch_operands = 0 : i64, tpu.core_type = #tpu.core_type<tc>, window_params = [{transform_indices = @transform_0, window_bounds = array<i64: 64, 128>}, {transform_indices = @transform_1, window_bounds = array<i64: 64, 128>}, {transform_indices = @transform_2, window_bounds = array<i64: 1, 8, 128>}]} {
    %c0_i32 = arith.constant 0 : i32
    %0 = arith.cmpi eq, %arg1, %c0_i32 : i32
    %1 = arith.extui %0 : i1 to i32
    %c0_i32_0 = arith.constant 0 : i32
    %2 = arith.cmpi ne, %1, %c0_i32_0 : i32
    scf.if %2 {
      %cst_16 = arith.constant 0.000000e+00 : f32
      %34 = vector.broadcast %cst_16 : f32 to vector<1x8x128xf32>
      %c0_17 = arith.constant 0 : index
      %c0_18 = arith.constant 0 : index
      %c0_19 = arith.constant 0 : index
      %35 = vector.load %arg4[%c0_17, %c0_18, %c0_19] : memref<1x8x128xf32, #tpu.memory_space<vmem>>, vector<1x8x128xf32>
      tpu.vector_store %arg4[%c0_17, %c0_18, %c0_19], %34 {strides = array<i32>} : memref<1x8x128xf32, #tpu.memory_space<vmem>>, vector<1x8x128xf32>,
    } else {
    }
    %cst = arith.constant 0.000000e+00 : f32
    %3 = vector.broadcast %cst : f32 to vector<8x128xf32>
    %c0 = arith.constant 0 : index
    %c0_1 = arith.constant 0 : index
    %4 = vector.load %arg2[%c0, %c0_1] : memref<64x128xf32, #tpu.memory_space<vmem>>, vector<64x128xf32>
    %cst_2 = arith.constant 0.000000e+00 : f32
    %5 = vector.broadcast %cst_2 : f32 to vector<64x128xf32>
    %6 = arith.subf %5, %4 : vector<64x128xf32>
    %c0_3 = arith.constant 0 : index
    %c0_4 = arith.constant 0 : index
    %7 = vector.load %arg3[%c0_3, %c0_4] : memref<64x128xf32, #tpu.memory_space<vmem>>, vector<64x128xf32>
    %8 = math.absf %6 : vector<64x128xf32>
    %cst_5 = arith.constant 0.000000e+00 : f32
    %9 = vector.broadcast %cst_5 : f32 to vector<64x128xf32>
    %10 = arith.subf %9, %8 : vector<64x128xf32>
    %11 = math.exp %10 : vector<64x128xf32>
    %12 = math.log1p %11 : vector<64x128xf32>
    %cst_6 = arith.constant 0.000000e+00 : f32
    %13 = vector.broadcast %cst_6 : f32 to vector<64x128xf32>
    %14 = arith.maximumf %6, %13 : vector<64x128xf32>
    %15 = arith.addf %14, %12 : vector<64x128xf32>
    %16 = math.absf %7 : vector<64x128xf32>
    %cst_7 = arith.constant 0.000000e+00 : f32
    %17 = vector.broadcast %cst_7 : f32 to vector<64x128xf32>
    %18 = arith.subf %17, %16 : vector<64x128xf32>
    %19 = math.exp %18 : vector<64x128xf32>
    %20 = math.log1p %19 : vector<64x128xf32>
    %cst_8 = arith.constant 0.000000e+00 : f32
    %21 = vector.broadcast %cst_8 : f32 to vector<64x128xf32>
    %22 = arith.maximumf %7, %21 : vector<64x128xf32>
    %23 = arith.addf %22, %20 : vector<64x128xf32>
    %24 = arith.addf %15, %23 : vector<64x128xf32>
    %25 = vector.shape_cast %24 : vector<64x128xf32> to vector<8x8x128xf32>
    %cst_9 = arith.constant dense<0.000000e+00> : vector<8x128xf32>
    %26 = vector.multi_reduction <add>, %25, %cst_9 [0] : vector<8x8x128xf32> to vector<8x128xf32>
    %27 = arith.addf %3, %26 : vector<8x128xf32>
    %c0_10 = arith.constant 0 : index
    %c0_11 = arith.constant 0 : index
    %c0_12 = arith.constant 0 : index
    %28 = vector.load %arg4[%c0_10, %c0_11, %c0_12] : memref<1x8x128xf32, #tpu.memory_space<vmem>>, vector<1x8x128xf32>
    %29 = vector.shape_cast %28 : vector<1x8x128xf32> to vector<8x128xf32>
    %30 = arith.addf %29, %27 : vector<8x128xf32>
    %c0_13 = arith.constant 0 : index
    %c0_14 = arith.constant 0 : index
    %c0_15 = arith.constant 0 : index
    %31 = vector.load %arg4[%c0_13, %c0_14, %c0_15] : memref<1x8x128xf32, #tpu.memory_space<vmem>>, vector<1x8x128xf32>
    %32 = vector.shape_cast %31 : vector<1x8x128xf32> to vector<8x128xf32>
    %33 = vector.shape_cast %30 : vector<8x128xf32> to vector<1x8x128xf32>
    tpu.vector_store %arg4[%c0_13, %c0_14, %c0_15], %33 {strides = array<i32>} : memref<1x8x128xf32, #tpu.memory_space<vmem>>, vector<1x8x128xf32>,
    return
  }
  func.func @transform_0(%arg0: i32, %arg1: i32) -> (i32, i32) {
    %c1_i32 = arith.constant 1 : i32
    %0 = arith.muli %arg0, %c1_i32 : i32
    %1 = arith.addi %0, %arg1 : i32
    %c0_i32 = arith.constant 0 : i32
    %c0_i32_0 = arith.constant 0 : i32
    return %1, %c0_i32 : i32, i32
  }
  func.func @transform_1(%arg0: i32, %arg1: i32) -> (i32, i32) {
    %c1_i32 = arith.constant 1 : i32
    %0 = arith.muli %arg0, %c1_i32 : i32
    %1 = arith.addi %0, %arg1 : i32
    %c0_i32 = arith.constant 0 : i32
    %c0_i32_0 = arith.constant 0 : i32
    return %1, %c0_i32 : i32, i32
  }
  func.func @transform_2(%arg0: i32, %arg1: i32) -> (i32, i32, i32) {
    %c0_i32 = arith.constant 0 : i32
    %c0_i32_0 = arith.constant 0 : i32
    %c0_i32_1 = arith.constant 0 : i32
    return %arg0, %c0_i32, %c0_i32_0 : i32, i32, i32
  }
}

</mosaic_0001>

<bundles_post_ra>
// kernel: vanila_loss.1
= control target key start
LH: loop header
LB: loop body
LE: loop exit
PB: predicated region body
PF: predicated region fallthrough
CT: control target
= control target key end

     0   :  { %s761_s0 = inlined_call_operand.vmem [shape: f32[64,128], index: 0, kind: input, shape index: {}]   ;;  %s762_s1 = inlined_call_operand.vmem [shape: f32[64,128], index: 1, kind: input, shape index: {}]   ;;  %s763_s2 = inlined_call_operand.vmem [shape: f32[1,8,128], index: 2, kind: output, shape index: {}]  }
   0x1   :  { %v60_v0 = vld [vmem:[%s761_s0] sm:$0xff]  ;;  %v445_v1 = vld [vmem:[%s761_s0 + $0x8] sm:$0xff]  ;;  %v450_v2 = vld [vmem:[%s761_s0 + $0x10] sm:$0xff] }
   0x2   :  { %v455_v3 = vld [vmem:[%s761_s0 + $0x18] sm:$0xff]  ;;  %v460_v4 = vld [vmem:[%s761_s0 + $0x20] sm:$0xff]  ;;  %v465_v5 = vld [vmem:[%s761_s0 + $0x28] sm:$0xff]  ;;  %v68_v6 = vsub.f32 0.0, %v60_v0  ;;  %v69_v7 = vsub.f32 0.0, %v445_v1  ;;  %v70_v8 = vsub.f32 0.0, %v450_v2 }
   0x3   :  { %v472_v9 = vld [vmem:[%s761_s0 + $0x30] sm:$0xff]  ;;  %v477_v10 = vld [vmem:[%s761_s0 + $0x38] sm:$0xff]  ;;  %v71_v11 = vsub.f32 0.0, %v455_v3  ;;  %v72_v12 = vsub.f32 0.0, %v460_v4  ;;  %v73_v13 = vsub.f32 0.0, %v465_v5  ;;  %v495_v32 = vld [vmem:[%s762_s1] sm:$0xff] }
   0x4   :  { %v74_v14 = vsub.f32 0.0, %v472_v9  ;;  %v75_v15 = vsub.f32 0.0, %v477_v10  ;;  %v84_v16 = vand.u32 2147483647, %v68_v6  ;;  %v85_v17 = vand.u32 2147483647, %v69_v7 }
   0x5   :  { %v86_v18 = vand.u32 2147483647, %v70_v8  ;;  %v87_v19 = vand.u32 2147483647, %v71_v11  ;;  %v88_v20 = vand.u32 2147483647, %v72_v12 }
   0x6   :  { %v89_v21 = vand.u32 2147483647, %v73_v13  ;;  %v90_v22 = vand.u32 2147483647, %v74_v14  ;;  %v91_v23 = vand.u32 2147483647, %v75_v15 }
   0x7   :  { %v92_v24 = vsub.f32 0.0, %v84_v16  ;;  %v93_v25 = vsub.f32 0.0, %v85_v17  ;;  %v94_v26 = vsub.f32 0.0, %v86_v18  ;;  %v95_v27 = vsub.f32 0.0, %v87_v19  ;;  %v500_v38 = vld [vmem:[%s762_s1 + $0x8] sm:$0xff]  ;;  %v505_v39 = vld [vmem:[%s762_s1 + $0x10] sm:$0xff] }
   0x8   :  { %v96_v28 = vsub.f32 0.0, %v88_v20  ;;  %v97_v29 = vsub.f32 0.0, %v89_v21  ;;  %v98_v33 = vsub.f32 0.0, %v90_v22  ;;  %v99_v36 = vsub.f32 0.0, %v91_v23  ;;  %v510_v40 = vld [vmem:[%s762_s1 + $0x18] sm:$0xff]  ;;  %v515_v41 = vld [vmem:[%s762_s1 + $0x20] sm:$0xff] }
   0x9   :  { %v100_v30 = vmul.f32 1.442695, %v92_v24  ;;  %v102_v31 = vmul.f32 1.442695, %v93_v25  ;;  %v104_v34 = vmul.f32 1.442695, %v94_v26 }
   0xa   :  { %v106_v35 = vmul.f32 1.442695, %v95_v27  ;;  %v108_v37 = vmul.f32 1.442695, %v96_v28  ;;  %v110_v42 = vmul.f32 1.442695, %v97_v29 }
   0xb   :  { %360 = vpow2.f32 %v100_v30  ;;  %v204_v43 = vand.u32 2147483647, %v495_v32  ;;  %v521_v44 = vld [vmem:[%s762_s1 + $0x28] sm:$0xff]  ;;  %v526_v45 = vld [vmem:[%s762_s1 + $0x30] sm:$0xff]  ;;  %v531_v46 = vld [vmem:[%s762_s1 + $0x38] sm:$0xff]  ;;  %v537_v54 = vmax.f32 %v68_v6, 0.0 }
   0xc   :  { %362 = vpow2.f32 %v102_v31  ;;  %v112_v47 = vmul.f32 1.442695, %v98_v33  ;;  %v114_v48 = vmul.f32 1.442695, %v99_v36  ;;  %v205_v49 = vand.u32 2147483647, %v500_v38 }
   0xd   :  { %364 = vpow2.f32 %v104_v34  ;;  %v206_v50 = vand.u32 2147483647, %v505_v39  ;;  %v207_v51 = vand.u32 2147483647, %v510_v40  ;;  %v208_v52 = vand.u32 2147483647, %v515_v41 }
   0xe   :  { %366 = vpow2.f32 %v106_v35  ;;  %v212_v53 = vsub.f32 0.0, %v204_v43  ;;  %v209_v55 = vand.u32 2147483647, %v521_v44  ;;  %v540_v56 = vmax.f32 %v69_v7, 0.0 }
   0xf   :  { %368 = vpow2.f32 %v108_v37  ;;  %v210_v57 = vand.u32 2147483647, %v526_v45  ;;  %v211_v58 = vand.u32 2147483647, %v531_v46  ;;  %v544_v59 = vmax.f32 %v70_v8, 0.0 }
  0x10   :  { %370 = vpow2.f32 %v110_v42  ;;  %v213_v60 = vsub.f32 0.0, %v205_v49  ;;  %v214_v61 = vsub.f32 0.0, %v206_v50  ;;  %v220_v62 = vmul.f32 1.442695, %v212_v53 }
  0x11   :  { %372 = vpow2.f32 %v112_v47  ;;  %v546_v63 = vmax.f32 %v71_v11, 0.0  ;;  %v215_v0 = vsub.f32 0.0, %v207_v51  ;;  %v216_v1 = vsub.f32 0.0, %v208_v52 }
  0x12   :  { %374 = vpow2.f32 %v114_v48  ;;  %v550_v3 = vmax.f32 %v72_v12, 0.0  ;;  %v554_v6 = vmax.f32 %v73_v13, 0.0  ;;  %v558_v7 = vmax.f32 %v74_v14, 0.0 }
  0x13   :  { %v217_v8 = vsub.f32 0.0, %v209_v55  ;;  %v562_v11 = vmax.f32 %v75_v15, 0.0  ;;  %v218_v18 = vsub.f32 0.0, %v210_v57  ;;  %v219_v19 = vsub.f32 0.0, %v211_v58 }
  0x14   :  { %376 = vpow2.f32 %v220_v62  ;;  %v222_v20 = vmul.f32 1.442695, %v213_v60  ;;  %v224_v5 = vmul.f32 1.442695, %v214_v61  ;;  %v226_v9 = vmul.f32 1.442695, %v215_v0 }
  0x15   :  { %v361_v2 = vpop.eup %360  ;;  %v564_v14 = vmul.f32 1.442695, %v216_v1  ;;  %v566_v10 = vmul.f32 1.442695, %v217_v8  ;;  %v568_v26 = vmul.f32 1.442695, %v218_v18 }
  0x16   :  { %v363_v16 = vpop.eup %362  ;;  %v116_v17 = vadd.f32 1.0, %v361_v2  ;;  %v119_v23 = vmul.f32 -0.5, %v361_v2  ;;  %v122_v28 = vand.u32 2147483647, %v361_v2  ;;  %v570_v30 = vmul.f32 1.442695, %v219_v19 }
  0x17   :  { %v365_v4 = vpop.eup %364  ;;  %v125_v12 = vadd.f32 1.0, %v363_v16  ;;  %v128_v24 = vmul.f32 -0.5, %v363_v16  ;;  %v131_v33 = vand.u32 2147483647, %v363_v16  ;;  %v308_v58 = vmax.f32 %v495_v32, 0.0 }
  0x18   :  { %v367_v13 = vpop.eup %366  ;;  %378 = vlog2.f32 %v116_v17  ;;  %v134_v21 = vadd.f32 1.0, %v365_v4  ;;  %v137_v15 = vmul.f32 -0.5, %v365_v4  ;;  %v120_v36 = vadd.f32 1.0, %v119_v23 }
  0x19   :  { %v369_v22 = vpop.eup %368  ;;  %380 = vlog2.f32 %v125_v12  ;;  %v143_v25 = vadd.f32 1.0, %v367_v13  ;;  %v146_v29 = vmul.f32 -0.5, %v367_v13  ;;  %v129_v37 = vadd.f32 1.0, %v128_v24 }
  0x1a   :  { %382 = vlog2.f32 %v134_v21  ;;  %v371_v27 = vpop.eup %370  ;;  %v152_v34 = vadd.f32 1.0, %v369_v22  ;;  %v155_v35 = vmul.f32 -0.5, %v369_v22  ;;  %v140_v42 = vand.u32 2147483647, %v365_v4 }
  0x1b   :  { %384 = vpow2.f32 %v222_v20  ;;  %v572_v31 = vpop.eup %372  ;;  %v138_v47 = vadd.f32 1.0, %v137_v15  ;;  %v149_v48 = vand.u32 2147483647, %v367_v13  ;;  %v161_v49 = vadd.f32 1.0, %v371_v27 }
  0x1c   :  { %386 = vlog2.f32 %v143_v25  ;;  %v574_v43 = vpop.eup %374  ;;  %v147_v50 = vadd.f32 1.0, %v146_v29  ;;  %v158_v51 = vand.u32 2147483647, %v369_v22  ;;  %v164_v52 = vmul.f32 -0.5, %v371_v27 }
  0x1d   :  { %388 = vpow2.f32 %v224_v5  ;;  %v170_v53 = vadd.f32 1.0, %v572_v31  ;;  %vm577_vm0 = vcmp.lt.f32.partialorder %v122_v28, 0.0004427343  ;;  %v156_v57 = vadd.f32 1.0, %v155_v35 }
  0x1e   :  { %390 = vlog2.f32 %v152_v34  ;;  %v582_v60 = vpop.eup %376  ;;  %vm584_vm1 = vcmp.lt.f32.partialorder %v131_v33, 0.0004427343  ;;  %v167_v62 = vand.u32 2147483647, %v371_v27  ;;  %v179_v0 = vadd.f32 1.0, %v574_v43 }
  0x1f   :  { %392 = vlog2.f32 %v161_v49  ;;  %v121_v8 = vmul.f32 %v361_v2, %v120_v36  ;;  %v130_v17 = vmul.f32 %v363_v16, %v129_v37  ;;  %v139_v18 = vmul.f32 %v365_v4, %v138_v47 }
  0x20   :  { %394 = vlog2.f32 %v170_v53  ;;  %vm589_vm2 = vcmp.lt.f32.partialorder %v140_v42, 0.0004427343  ;;  %v148_v20 = vmul.f32 %v367_v13, %v147_v50  ;;  %vm593_vm3 = vcmp.lt.f32.partialorder %v149_v48, 0.0004427343 }
  0x21   :  { %vm597_vm4 = vcmp.lt.f32.partialorder %v158_v51, 0.0004427343  ;;  %v165_v23 = vadd.f32 1.0, %v164_v52  ;;  %v157_v15 = vmul.f32 %v369_v22, %v156_v57  ;;  %v173_v2 = vmul.f32 -0.5, %v572_v31 }
  0x22   :  { %v379_v1 = vpop.eup %378  ;;  %396 = vlog2.f32 %v179_v0  ;;  %v182_v16 = vmul.f32 -0.5, %v574_v43  ;;  %vm605_vm5 = vcmp.lt.f32.partialorder %v167_v62, 0.0004427343  ;;  %v236_v28 = vadd.f32 1.0, %v582_v60 }
  0x23   :  { %v381_v12 = vpop.eup %380  ;;  %v118_v25 = vmul.f32 0.6931472, %v379_v1  ;;  %398 = vpow2.f32 %v226_v9  ;;  %v239_v22 = vmul.f32 -0.5, %v582_v60  ;;  %v166_v37 = vmul.f32 %v371_v27, %v165_v23 }
  0x24   :  { %v383_v24 = vpop.eup %382  ;;  %v127_v33 = vmul.f32 0.6931472, %v381_v12  ;;  %400 = vpow2.f32 %v564_v14  ;;  %v176_v42 = vand.u32 2147483647, %v572_v31  ;;  %v174_v48 = vadd.f32 1.0, %v173_v2 }
  0x25   :  { %v603_v4 = vpop.eup %384  ;;  %v136_v34 = vmul.f32 0.6931472, %v383_v24  ;;  %402 = vpow2.f32 %v566_v10  ;;  %v183_v9 = vadd.f32 1.0, %v182_v16  ;;  %v185_v49 = vand.u32 2147483647, %v574_v43 }
  0x26   :  { %v387_v29 = vpop.eup %386  ;;  %404 = vpow2.f32 %v568_v26  ;;  %v124_v14 = vsel %vm577_vm0, %v121_v8, %v118_v25  ;;  %v245_v51 = vadd.f32 1.0, %v603_v4  ;;  %v133_v52 = vsel %vm584_vm1, %v130_v17, %v127_v33 }
  0x27   :  { %v612_v35 = vpop.eup %388  ;;  %v145_v36 = vmul.f32 0.6931472, %v387_v29  ;;  %406 = vpow2.f32 %v570_v30  ;;  %v142_v10 = vsel %vm589_vm2, %v139_v18, %v136_v34  ;;  %v240_v53 = vadd.f32 1.0, %v239_v22 }
  0x28   :  { %v391_v47 = vpop.eup %390  ;;  %408 = vlog2.f32 %v236_v28  ;;  %v242_v62 = vand.u32 2147483647, %v582_v60  ;;  %v175_v30 = vmul.f32 %v572_v31, %v174_v48  ;;  %vm630_vm6 = vcmp.lt.f32.partialorder %v176_v42, 0.0004427343 }
  0x29   :  { %v154_v50 = vmul.f32 0.6931472, %v391_v47  ;;  %v393_v27 = vpop.eup %392  ;;  %v151_v26 = vsel %vm593_vm3, %v148_v20, %v145_v36  ;;  %410 = vlog2.f32 %v245_v51  ;;  %v635_v61 = vmul.f32 %v574_v43, %v183_v9 }
  0x2a   :  { %v395_v57 = vpop.eup %394  ;;  %v163_v55 = vmul.f32 0.6931472, %v393_v27  ;;  %v254_v1 = vadd.f32 1.0, %v612_v35  ;;  %v641_v18 = vadd.f32 %v537_v54, %v124_v14  ;;  %v248_v19 = vmul.f32 -0.5, %v603_v4 }
  0x2b   :  { %v160_v8 = vsel %vm597_vm4, %v157_v15, %v154_v50  ;;  %v172_v17 = vmul.f32 0.6931472, %v395_v57  ;;  %v645_v31 = vadd.f32 %v540_v56, %v133_v52  ;;  %v648_v20 = vadd.f32 %v544_v59, %v142_v10 }
  0x2c   :  { %v397_v12 = vpop.eup %396  ;;  %v651_v5 = vadd.f32 %v546_v63, %v151_v26  ;;  %v257_v23 = vmul.f32 -0.5, %v612_v35  ;;  %v169_v24 = vsel %vm605_vm5, %v166_v37, %v163_v55  ;;  %v657_v54 = vmul.f32 %v582_v60, %v240_v53 }
  0x2d   :  { %v399_v21 = vpop.eup %398  ;;  %vm659_vm7 = vcmp.lt.f32.partialorder %v242_v62, 0.0004427343  ;;  %412 = vlog2.f32 %v254_v1  ;;  %v664_v59 = vadd.f32 %v550_v3, %v160_v8  ;;  %v251_v63 = vand.u32 2147483647, %v603_v4 }
  0x2e   :  { %v401_v56 = vpop.eup %400  ;;  %v263_v2 = vadd.f32 1.0, %v399_v21  ;;  %v266_v16 = vmul.f32 -0.5, %v399_v21  ;;  %v178_v13 = vsel %vm630_vm6, %v175_v30, %v172_v17  ;;  %v249_v28 = vadd.f32 1.0, %v248_v19 }
  0x2f   :  { %v403_v25 = vpop.eup %402  ;;  %v260_v60 = vand.u32 2147483647, %v612_v35  ;;  %v272_v29 = vadd.f32 1.0, %v401_v56  ;;  %v672_v34 = vmul.f32 0.6931472, %v397_v12  ;;  %v675_v22 = vadd.f32 %v554_v6, %v169_v24 }
  0x30   :  { %v670_v33 = vpop.eup %404  ;;  %v258_v3 = vadd.f32 1.0, %v257_v23  ;;  %414 = vlog2.f32 %v263_v2  ;;  %v275_v37 = vmul.f32 -0.5, %v401_v56  ;;  %v281_v42 = vadd.f32 1.0, %v403_v25 }
  0x31   :  { %v677_v36 = vpop.eup %406  ;;  %416 = vlog2.f32 %v272_v29  ;;  %v284_v47 = vmul.f32 -0.5, %v403_v25  ;;  %v680_v9 = vadd.f32 %v558_v7, %v178_v13  ;;  %vm682_vm8 = vcmp.lt.f32.partialorder %v251_v63, 0.0004427343 }
  0x32   :  { %v409_v48 = vpop.eup %408  ;;  %v267_v50 = vadd.f32 1.0, %v266_v16  ;;  %v269_v51 = vand.u32 2147483647, %v399_v21  ;;  %v278_v52 = vand.u32 2147483647, %v401_v56  ;;  %418 = vlog2.f32 %v281_v42 }
  0x33   :  { %v411_v6 = vpop.eup %410  ;;  %v238_v27 = vmul.f32 0.6931472, %v409_v48  ;;  %v290_v10 = vadd.f32 1.0, %v670_v33  ;;  %v250_v57 = vmul.f32 %v603_v4, %v249_v28  ;;  %v259_v26 = vmul.f32 %v612_v35, %v258_v3 }
  0x34   :  { %v247_v53 = vmul.f32 0.6931472, %v411_v6  ;;  %vm689_vm9 = vcmp.lt.f32.partialorder %v260_v60, 0.0004427343  ;;  %vm695_vm10 = vcmp.lt.f32.partialorder %v185_v49, 0.0004427343  ;;  %v268_v1 = vmul.f32 %v399_v21, %v267_v50 }
  0x35   :  { %v276_v62 = vadd.f32 1.0, %v275_v37  ;;  %v285_v30 = vadd.f32 1.0, %v284_v47  ;;  %v287_v0 = vand.u32 2147483647, %v403_v25  ;;  %420 = vlog2.f32 %v290_v10 }
  0x36   :  { %vm699_vm11 = vcmp.lt.f32.partialorder %v269_v51, 0.0004427343  ;;  %v293_v4 = vmul.f32 -0.5, %v670_v33  ;;  %v299_v35 = vadd.f32 1.0, %v677_v36  ;;  %v244_v43 = vsel %vm659_vm7, %v657_v54, %v238_v27 }
  0x37   :  { %v413_v17 = vpop.eup %412  ;;  %vm708_vm12 = vcmp.lt.f32.partialorder %v278_v52, 0.0004427343  ;;  %v309_v19 = vmax.f32 %v500_v38, 0.0  ;;  %v310_v12 = vmax.f32 %v505_v39, 0.0  ;;  %v253_v23 = vsel %vm682_vm8, %v250_v57, %v247_v53 }
  0x38   :  { %v256_v21 = vmul.f32 0.6931472, %v413_v17  ;;  %422 = vlog2.f32 %v299_v35  ;;  %v302_v24 = vmul.f32 -0.5, %v677_v36  ;;  %v277_v63 = vmul.f32 %v401_v56, %v276_v62 }
  0x39   :  { %v286_v2 = vmul.f32 %v403_v25, %v285_v30  ;;  %vm717_vm13 = vcmp.lt.f32.partialorder %v287_v0, 0.0004427343  ;;  %v296_v54 = vand.u32 2147483647, %v670_v33  ;;  %v294_v39 = vadd.f32 1.0, %v293_v4 }
  0x3a   :  { %v415_v16 = vpop.eup %414  ;;  %v262_v38 = vsel %vm689_vm9, %v259_v26, %v256_v21  ;;  %v311_v13 = vmax.f32 %v510_v40, 0.0  ;;  %v312_v28 = vmax.f32 %v515_v41, 0.0  ;;  %v316_v56 = vadd.f32 %v308_v58, %v244_v43 }
  0x3b   :  { %v417_v60 = vpop.eup %416  ;;  %v265_v29 = vmul.f32 0.6931472, %v415_v16  ;;  %v317_v25 = vadd.f32 %v309_v19, %v253_v23  ;;  %v318_v3 = vadd.f32 %v310_v12, %v262_v38  ;;  %v303_v42 = vadd.f32 1.0, %v302_v24 }
  0x3c   :  { %v274_v37 = vmul.f32 0.6931472, %v417_v60  ;;  %v305_v47 = vand.u32 2147483647, %v677_v36  ;;  %v313_v48 = vmax.f32 %v521_v44, 0.0  ;;  %v419_v14 = vpop.eup %418  ;;  %v324_v40 = vadd.f32 %v316_v56, %v641_v18 }
  0x3d   :  { %v271_v50 = vsel %vm699_vm11, %v268_v1, %v265_v29  ;;  %v325_v41 = vadd.f32 %v317_v25, %v645_v31  ;;  %v326_v51 = vadd.f32 %v318_v3, %v648_v20  ;;  %v283_v58 = vmul.f32 0.6931472, %v419_v14 }
  0x3e   :  { %v280_v32 = vsel %vm708_vm12, %v277_v63, %v274_v37  ;;  %v295_v6 = vmul.f32 %v670_v33, %v294_v39  ;;  %v319_v27 = vadd.f32 %v311_v13, %v271_v50  ;;  %vm738_vm14 = vcmp.lt.f32.partialorder %v296_v54, 0.0004427343 }
  0x3f   :  { %v421_v52 = vpop.eup %420  ;;  %v314_v10 = vmax.f32 %v526_v45, 0.0  ;;  %v320_v53 = vadd.f32 %v312_v28, %v280_v32  ;;  %v332_v18 = vadd.f32 %v325_v41, %v324_v40  ;;  %v187_v31 = vsel %vm695_vm10, %v635_v61, %v672_v34 }
  0x40   :  { %v289_v20 = vsel %vm717_vm13, %v286_v2, %v283_v58  ;;  %v292_v57 = vmul.f32 0.6931472, %v421_v52  ;;  %v327_v33 = vadd.f32 %v319_v27, %v651_v5  ;;  %v304_v26 = vmul.f32 %v677_v36, %v303_v42 }
  0x41   :  { %v321_v7 = vadd.f32 %v313_v48, %v289_v20  ;;  %v328_v62 = vadd.f32 %v320_v53, %v664_v59  ;;  %v333_v30 = vadd.f32 %v332_v18, %v326_v51  ;;  %vm306_vm15 = vcmp.lt.f32.partialorder %v305_v47, 0.0004427343 }
  0x42   :  { %v423_v45 = vpop.eup %422  ;;  %v298_v0 = vsel %vm738_vm14, %v295_v6, %v292_v57  ;;  %v315_v55 = vmax.f32 %v531_v46, 0.0  ;;  %v203_v5 = vadd.f32 %v562_v11, %v187_v31 }
  0x43   :  { %v301_v61 = vmul.f32 0.6931472, %v423_v45  ;;  %v322_v34 = vadd.f32 %v314_v10, %v298_v0  ;;  %v329_v1 = vadd.f32 %v321_v7, %v675_v22  ;;  %v334_v8 = vadd.f32 %v333_v30, %v327_v33 }
  0x45   :  { %v307_v4 = vsel %vm306_vm15, %v304_v26, %v301_v61  ;;  %v330_v36 = vadd.f32 %v322_v34, %v680_v9  ;;  %v335_v35 = vadd.f32 %v334_v8, %v328_v62 }
  0x46   :  { %v323_v59 = vadd.f32 %v315_v55, %v307_v4 }
  0x47   :  { %v336_v17 = vadd.f32 %v335_v35, %v329_v1 }
  0x48   :  { %v331_v43 = vadd.f32 %v323_v59, %v203_v5 }
  0x49   :  { %v337_v49 = vadd.f32 %v336_v17, %v330_v36 }
  0x4b   :  { %v338_v19 = vadd.f32 %v337_v49, %v331_v43 }
  0x4d   :  { %342 = vst [vmem:[%s763_s2] sm:$0xff] %v338_v19 }

</bundles_post_ra>
